<compile_context>
chip_gen: v7x
topology: tpu7x:2x2x1
jax: 0.10.0
libtpu: 0.0.40
codegen_flags: <defaults>
</compile_context>

<pallas_src>
import functools

import jax
import jax.numpy as jnp
from jax import lax
from jax.experimental import pallas as pl
from jax.experimental.pallas import tpu as pltpu


def _round_up(v, m):
    return (v + m - 1) // m * m


# ---------------------------------------------------------------------------
# Kernel
# ---------------------------------------------------------------------------
def _birdclef_kernel(p_ref, wk_ref, bconv_ref, wfc_ref, bfc_ref,
                     out_ref, acc_ref, *,
                     chunk, n_chunks, m_tile, m_valid, mask_needed):
    """One (batch, M-tile) step of the fused conv-stem + SiLU + pool + fc.

    p_ref:     (1, m_tile, K)   bf16  im2col patches (K = 9*Cin on lanes)
    wk_ref:    (K, Cf_pad)      bf16  conv-stem weight
    bconv_ref: (1, Cf_pad)      f32
    wfc_ref:   (Cf_pad, NT_pad) f32   fc weight (transposed, lane-padded)
    bfc_ref:   (1, NT_pad)      f32
    out_ref:   (1, 1, NT_pad)   f32   logits, written on the last M tile
    acc_ref:   (1, Cf_pad)      f32   VMEM scratch: per-image channel sum
    """
    t = pl.program_id(1)

    @pl.when(t == 0)
    def _init():
        acc_ref[...] = jnp.zeros_like(acc_ref)

    def body(ci, acc):
        start = pl.multiple_of(ci * chunk, chunk)
        pc = p_ref[0, pl.ds(start, chunk), :]                # (chunk, K) bf16
        conv = jnp.dot(pc, wk_ref[...],
                       preferred_element_type=jnp.float32) + bconv_ref[...]
        feat = conv * jax.nn.sigmoid(conv)                   # SiLU (f32)
        if mask_needed:
            gidx = (t * m_tile + start
                    + lax.broadcasted_iota(jnp.int32, (chunk, 1), 0))
            feat = jnp.where(gidx < m_valid, feat, 0.0)      # zero the M padding
        return acc + jnp.sum(feat, axis=0, keepdims=True)

    partial = lax.fori_loop(
        0, n_chunks, body,
        jnp.zeros(acc_ref.shape, acc_ref.dtype),
        unroll=(n_chunks <= 8))
    acc_ref[...] += partial

    @pl.when(t == pl.num_programs(1) - 1)
    def _finalize():
        pooled = acc_ref[...] * (1.0 / m_valid)              # avg pool, f32
        # Dropout is identity in eval mode; Linear head kept in f32.
        logits = jnp.dot(pooled, wfc_ref[...],
                         preferred_element_type=jnp.float32) + bfc_ref[...]
        out_ref[0] = logits


# ---------------------------------------------------------------------------
# Generation-aware sizing helpers
# ---------------------------------------------------------------------------
def _vmem_limit_bytes():
    """~75% of the chip's physical VMEM, clamped to [32, 96] MiB."""
    cap = 64 * 1024 * 1024
    try:
        cap = int(pltpu.get_tpu_info().vmem_capacity_bytes)
    except Exception:
        pass
    return max(32 * 1024 * 1024, min(cap * 3 // 4, 96 * 1024 * 1024))


def _pick_m_tile(m, k, vmem_limit):
    """Largest M tile whose double-buffered patch block fits ~half the budget."""
    k_lanes = _round_up(k, 128)          # bf16 rows are lane-padded to 128
    per_row = 2 * k_lanes * 2            # double-buffered bf16 bytes per M row
    m_tile = (vmem_limit // 2) // per_row
    m_tile = min(m_tile, _round_up(m, 8), 4096)
    return max(8, m_tile // 8 * 8)


def _pick_chunk(m_tile, cf_pad):
    """Largest inner chunk whose (chunk, Cf_pad) f32 intermediate is ~<= 1 MiB."""
    chunk = max(8, min(m_tile, (1 << 20) // (cf_pad * 4)) // 8 * 8)
    while m_tile % chunk:
        chunk -= 8
    return max(8, chunk)


# ---------------------------------------------------------------------------
# Host wrapper (mirrors BirdCLEFModel.forward, eval mode)
# ---------------------------------------------------------------------------
def birdclef_forward(x_nchw, w_conv, b_conv, w_fc, b_fc, y_batch=None):
    """x_nchw: (B, Cin, H, W) f32; w_conv: (9, Cin, Cf); b_conv: (Cf,);
    w_fc: (NT, Cf) (PyTorch nn.Linear layout); b_fc: (NT,).
    Returns (logits (B, NT), y_batch)."""
    B, Cin, H, W = x_nchw.shape
    Cf = w_conv.shape[-1]
    NT = w_fc.shape[0]
    K = 9 * Cin
    M = H * W

    LANE = 128
    Cf_pad = _round_up(Cf, LANE)
    NT_pad = _round_up(NT, LANE)

    vmem_limit = _vmem_limit_bytes()
    m_tile = _pick_m_tile(M, K, vmem_limit)
    M_pad = _round_up(M, m_tile)
    n_m_tiles = M_pad // m_tile
    chunk = _pick_chunk(m_tile, Cf_pad)
    n_chunks = m_tile // chunk
    mask_needed = (M_pad != M)

    # ---- host-side layout glue: NCHW -> NHWC -> halo pad -> im2col --------
    # This is pure layout work done once in XLA; all FLOPs (conv matmul, SiLU,
    # pooling, fc) stay inside the kernel.  K trails so every VMEM/vreg row of
    # the patches is lane-dense (no Cin=3..4 trailing-dim blowup) and the
    # kernel needs no retiling copies.
    x_nhwc = jnp.transpose(x_nchw, (0, 2, 3, 1))
    x_p = jnp.pad(x_nhwc, ((0, 0), (1, 1), (1, 1), (0, 0)))
    taps = [x_p[:, dy:dy + H, dx:dx + W, :]
            for dy in range(3) for dx in range(3)]
    patches = jnp.stack(taps, axis=3).reshape(B, M, K)       # k = (dy*3+dx)*Cin+c
    if mask_needed:
        patches = jnp.pad(patches, ((0, 0), (0, M_pad - M), (0, 0)))
    patches = patches.astype(jnp.bfloat16)

    # Conv weight (9, Cin, Cf) -> (K, Cf_pad) bf16, matching the k ordering.
    w_k = jnp.zeros((K, Cf_pad), jnp.float32)
    w_k = w_k.at[:, :Cf].set(w_conv.reshape(K, Cf)).astype(jnp.bfloat16)
    bconv2 = jnp.zeros((1, Cf_pad), jnp.float32).at[0, :Cf].set(b_conv)

    # fc kept in f32 (negligible compute, avoids bf16 drift of the head).
    wfc_t = jnp.zeros((Cf_pad, NT_pad), jnp.float32)
    wfc_t = wfc_t.at[:Cf, :NT].set(jnp.transpose(w_fc))
    bfc2 = jnp.zeros((1, NT_pad), jnp.float32).at[0, :NT].set(b_fc)

    kernel = functools.partial(
        _birdclef_kernel, chunk=chunk, n_chunks=n_chunks, m_tile=m_tile,
        m_valid=M, mask_needed=mask_needed)

    flops = 2 * B * M * K * Cf_pad + 2 * B * Cf_pad * NT_pad
    bytes_accessed = (patches.size * 2 + w_k.size * 2 + wfc_t.size * 4
                      + bconv2.size * 4 + bfc2.size * 4 + B * NT_pad * 4)
    cost = pl.CostEstimate(flops=flops, transcendentals=B * M * Cf_pad,
                           bytes_accessed=bytes_accessed)

    grid_spec = pltpu.PrefetchScalarGridSpec(
        num_scalar_prefetch=0,
        grid=(B, n_m_tiles),
        in_specs=[
            # Patch slab for this (image, M tile) only -> bounded double buffer.
            pl.BlockSpec((1, m_tile, K), lambda b, t: (b, t, 0)),
            pl.BlockSpec((K, Cf_pad), lambda b, t: (0, 0)),
            pl.BlockSpec((1, Cf_pad), lambda b, t: (0, 0)),
            pl.BlockSpec((Cf_pad, NT_pad), lambda b, t: (0, 0)),
            pl.BlockSpec((1, NT_pad), lambda b, t: (0, 0)),
        ],
        out_specs=pl.BlockSpec((1, 1, NT_pad), lambda b, t: (b, 0, 0)),
        scratch_shapes=[pltpu.VMEM((1, Cf_pad), jnp.float32)],
    )

    logits_pad = pl.pallas_call(
        kernel,
        out_shape=jax.ShapeDtypeStruct((B, 1, NT_pad), jnp.float32),
        grid_spec=grid_spec,
        compiler_params=pltpu.CompilerParams(
            dimension_semantics=("parallel", "arbitrary"),
            vmem_limit_bytes=vmem_limit),
        cost_estimate=cost,
    )(patches, w_k, bconv2, wfc_t, bfc2)

    return logits_pad[:, 0, :NT], y_batch


# ---------------------------------------------------------------------------
# Pure-JAX f32 reference of the same eval-mode forward
# ---------------------------------------------------------------------------
def _reference_forward(x_nchw, w_conv, b_conv, w_fc, b_fc):
    B, Cin, H, W = x_nchw.shape
    xp = jnp.pad(jnp.transpose(x_nchw, (0, 2, 3, 1)),
                 ((0, 0), (1, 1), (1, 1), (0, 0)))
    acc = None
    for dy in range(3):
        for dx in range(3):
            term = jnp.einsum('bhwc,cf->bhwf',
                              xp[:, dy:dy + H, dx:dx + W, :],
                              w_conv[dy * 3 + dx])
            acc = term if acc is None else acc + term
    acc = acc + b_conv
    feat = acc * jax.nn.sigmoid(acc)
    pooled = feat.mean(axis=(1, 2))
    return pooled @ w_fc.T + b_fc


if __name__ == "__main__":
    # Small deterministic shapes consistent with the module's forward:
    #   input (B, Cin, H, W); backbone feature width Cf (stands in for
    #   efficientnet_b0's in_features); NUM_TARGETS = NT.
    B, Cin, H, W = 2, 4, 16, 16
    Cf, NT = 32, 8

    key = jax.random.PRNGKey(0)
    k_x, k_wc, k_wfc = jax.random.split(key, 3)

    x = jax.random.normal(k_x, (B, Cin, H, W), dtype=jnp.float32)

    # Conv stem stand-in weights (deterministic).
    w_conv = 0.1 * jax.random.normal(k_wc, (9, Cin, Cf), dtype=jnp.float32)
    b_conv = jnp.zeros((Cf,), jnp.float32)

    # fc: Xavier-uniform weight (as init_layer does), zero bias.
    bound = (6.0 / (Cf + NT)) ** 0.5
    w_fc = jax.random.uniform(k_wfc, (NT, Cf), minval=-bound, maxval=bound,
                              dtype=jnp.float32)
    b_fc = jnp.zeros((NT,), jnp.float32)

    logits, y_out = birdclef_forward(x, w_conv, b_conv, w_fc, b_fc, y_batch=None)
    logits = jax.block_until_ready(logits)

    assert logits.shape == (B, NT)
    assert bool(jnp.all(jnp.isfinite(logits)))

    # Sanity-check against the pure-JAX f32 reference (bf16 conv operands).
    ref = _reference_forward(x, w_conv, b_conv, w_fc, b_fc)
    assert float(jnp.max(jnp.abs(logits - ref))) < 1e-1

    print("KERNEL_OK")
</pallas_src>

<mosaic_0001>
module attributes {stable_mosaic.version = 11 : i64} {
  func.func @_birdclef_kernel(%arg0: i32, %arg1: i32, %arg2: memref<1x256x36xbf16, #tpu.memory_space<vmem>>, %arg3: memref<36x128xbf16, #tpu.memory_space<vmem>>, %arg4: memref<1x128xf32, #tpu.memory_space<vmem>>, %arg5: memref<128x128xf32, #tpu.memory_space<vmem>>, %arg6: memref<1x128xf32, #tpu.memory_space<vmem>>, %arg7: memref<1x1x128xf32, #tpu.memory_space<vmem>>, %arg8: memref<1x128xf32, #tpu.memory_space<vmem>>) attributes {dimension_semantics = [#tpu.dimension_semantics<parallel>, #tpu.dimension_semantics<arbitrary>], iteration_bounds = array<i64: 2, 1>, scalar_prefetch = 0 : i64, scratch_operands = 1 : i64, tpu.core_type = #tpu.core_type<tc>, window_params = [{transform_indices = @transform_0, window_bounds = array<i64: 1, 256, 36>}, {pipeline_mode = #tpu.pipeline_mode<synchronous>, transform_indices = @transform_1, window_bounds = array<i64: 36, 128>}, {pipeline_mode = #tpu.pipeline_mode<synchronous>, transform_indices = @transform_2, window_bounds = array<i64: 1, 128>}, {pipeline_mode = #tpu.pipeline_mode<synchronous>, transform_indices = @transform_3, window_bounds = array<i64: 128, 128>}, {pipeline_mode = #tpu.pipeline_mode<synchronous>, transform_indices = @transform_4, window_bounds = array<i64: 1, 128>}, {transform_indices = @transform_5, window_bounds = array<i64: 1, 1, 128>}]} {
    %c0_i32 = arith.constant 0 : i32
    %0 = arith.cmpi eq, %arg1, %c0_i32 : i32
    %1 = arith.extui %0 : i1 to i32
    %c0_i32_0 = arith.constant 0 : i32
    %2 = arith.cmpi ne, %1, %c0_i32_0 : i32
    scf.if %2 {
      %cst_16 = arith.constant 0.000000e+00 : f32
      %29 = vector.broadcast %cst_16 : f32 to vector<1x128xf32>
      %c0_17 = arith.constant 0 : index
      %c0_18 = arith.constant 0 : index
      %30 = vector.load %arg8[%c0_17, %c0_18] : memref<1x128xf32, #tpu.memory_space<vmem>>, vector<1x128xf32>
      tpu.vector_store %arg8[%c0_17, %c0_18], %29 {strides = array<i32>} : memref<1x128xf32, #tpu.memory_space<vmem>>, vector<1x128xf32>,
    } else {
    }
    %cst = arith.constant 0.000000e+00 : f32
    %3 = vector.broadcast %cst : f32 to vector<1x128xf32>
    %c0_i32_1 = arith.constant 0 : i32
    %c256_i32 = arith.constant 256 : i32
    %4 = arith.muli %c0_i32_1, %c256_i32 : i32
    %5 = tpu.assume_multiple %4, 256 : i32
    %c0 = arith.constant 0 : index
    %6 = arith.index_cast %5 : i32 to index
    %c0_2 = arith.constant 0 : index
    %7 = vector.load %arg2[%c0, %6, %c0_2] : memref<1x256x36xbf16, #tpu.memory_space<vmem>>, vector<1x256x36xbf16>
    %8 = vector.shape_cast %7 : vector<1x256x36xbf16> to vector<256x36xbf16>
    %c0_3 = arith.constant 0 : index
    %c0_4 = arith.constant 0 : index
    %9 = vector.load %arg3[%c0_3, %c0_4] : memref<36x128xbf16, #tpu.memory_space<vmem>>, vector<36x128xbf16>
    %cst_5 = arith.constant dense<0.000000e+00> : vector<256x128xf32>
    %10 = tpu.matmul %8, %9, %cst_5 {dimension_numbers = #tpu.dot_dimension_numbers<[1], [0], [0], [1], [0, 0, 1, 1], [], []>} : vector<256x36xbf16>, vector<36x128xbf16>, vector<256x128xf32> -> vector<256x128xf32>
    %c0_6 = arith.constant 0 : index
    %c0_7 = arith.constant 0 : index
    %11 = vector.load %arg4[%c0_6, %c0_7] : memref<1x128xf32, #tpu.memory_space<vmem>>, vector<1x128xf32>
    %12 = vector.broadcast %11 : vector<1x128xf32> to vector<256x128xf32>
    %13 = arith.addf %10, %12 : vector<256x128xf32>
    %14 = arith.negf %13 : vector<256x128xf32>
    %15 = math.exp %14 : vector<256x128xf32>
    %cst_8 = arith.constant 1.000000e+00 : f32
    %16 = vector.broadcast %cst_8 : f32 to vector<256x128xf32>
    %17 = arith.addf %16, %15 : vector<256x128xf32>
    %18 = arith.divf %16, %17 : vector<256x128xf32>
    %19 = arith.mulf %13, %18 : vector<256x128xf32>
    %cst_9 = arith.constant dense<0.000000e+00> : vector<128xf32>
    %20 = vector.multi_reduction <add>, %19, %cst_9 [0] : vector<256x128xf32> to vector<128xf32>
    %21 = vector.shape_cast %20 : vector<128xf32> to vector<1x128xf32>
    %22 = arith.addf %3, %21 : vector<1x128xf32>
    %c1_i32 = arith.constant 1 : i32
    %c0_10 = arith.constant 0 : index
    %c0_11 = arith.constant 0 : index
    %23 = vector.load %arg8[%c0_10, %c0_11] : memref<1x128xf32, #tpu.memory_space<vmem>>, vector<1x128xf32>
    %24 = arith.addf %23, %22 : vector<1x128xf32>
    %c0_12 = arith.constant 0 : index
    %c0_13 = arith.constant 0 : index
    %25 = vector.load %arg8[%c0_12, %c0_13] : memref<1x128xf32, #tpu.memory_space<vmem>>, vector<1x128xf32>
    tpu.vector_store %arg8[%c0_12, %c0_13], %24 {strides = array<i32>} : memref<1x128xf32, #tpu.memory_space<vmem>>, vector<1x128xf32>,
    %c0_i32_14 = arith.constant 0 : i32
    %26 = arith.cmpi eq, %arg1, %c0_i32_14 : i32
    %27 = arith.extui %26 : i1 to i32
    %c0_i32_15 = arith.constant 0 : i32
    %28 = arith.cmpi ne, %27, %c0_i32_15 : i32
    scf.if %28 {
      %c0_16 = arith.constant 0 : index
      %c0_17 = arith.constant 0 : index
      %29 = vector.load %arg8[%c0_16, %c0_17] : memref<1x128xf32, #tpu.memory_space<vmem>>, vector<1x128xf32>
      %cst_18 = arith.constant 3.906250e-03 : f32
      %30 = vector.broadcast %cst_18 : f32 to vector<1x128xf32>
      %31 = arith.mulf %29, %30 : vector<1x128xf32>
      %c0_19 = arith.constant 0 : index
      %c0_20 = arith.constant 0 : index
      %32 = vector.load %arg5[%c0_19, %c0_20] : memref<128x128xf32, #tpu.memory_space<vmem>>, vector<128x128xf32>
      %cst_21 = arith.constant dense<0.000000e+00> : vector<1x128xf32>
      %33 = tpu.matmul %31, %32, %cst_21 {dimension_numbers = #tpu.dot_dimension_numbers<[1], [0], [0], [1], [0, 0, 1, 1], [], []>} : vector<1x128xf32>, vector<128x128xf32>, vector<1x128xf32> -> vector<1x128xf32>
      %c0_22 = arith.constant 0 : index
      %c0_23 = arith.constant 0 : index
      %34 = vector.load %arg6[%c0_22, %c0_23] : memref<1x128xf32, #tpu.memory_space<vmem>>, vector<1x128xf32>
      %35 = arith.addf %33, %34 : vector<1x128xf32>
      %c0_24 = arith.constant 0 : index
      %c0_25 = arith.constant 0 : index
      %c0_26 = arith.constant 0 : index
      %36 = vector.load %arg7[%c0_24, %c0_25, %c0_26] : memref<1x1x128xf32, #tpu.memory_space<vmem>>, vector<1x1x128xf32>
      %37 = vector.shape_cast %36 : vector<1x1x128xf32> to vector<1x128xf32>
      %38 = vector.shape_cast %35 : vector<1x128xf32> to vector<1x1x128xf32>
      tpu.vector_store %arg7[%c0_24, %c0_25, %c0_26], %38 {strides = array<i32>} : memref<1x1x128xf32, #tpu.memory_space<vmem>>, vector<1x1x128xf32>,
    } else {
    }
    return
  }
  func.func @transform_0(%arg0: i32, %arg1: i32) -> (i32, i32, i32) {
    %c0_i32 = arith.constant 0 : i32
    %c0_i32_0 = arith.constant 0 : i32
    return %arg0, %arg1, %c0_i32 : i32, i32, i32
  }
  func.func @transform_1(%arg0: i32, %arg1: i32) -> (i32, i32) {
    %c0_i32 = arith.constant 0 : i32
    %c0_i32_0 = arith.constant 0 : i32
    %c0_i32_1 = arith.constant 0 : i32
    return %c0_i32, %c0_i32_0 : i32, i32
  }
  func.func @transform_2(%arg0: i32, %arg1: i32) -> (i32, i32) {
    %c0_i32 = arith.constant 0 : i32
    %c0_i32_0 = arith.constant 0 : i32
    %c0_i32_1 = arith.constant 0 : i32
    return %c0_i32, %c0_i32_0 : i32, i32
  }
  func.func @transform_3(%arg0: i32, %arg1: i32) -> (i32, i32) {
    %c0_i32 = arith.constant 0 : i32
    %c0_i32_0 = arith.constant 0 : i32
    %c0_i32_1 = arith.constant 0 : i32
    return %c0_i32, %c0_i32_0 : i32, i32
  }
  func.func @transform_4(%arg0: i32, %arg1: i32) -> (i32, i32) {
    %c0_i32 = arith.constant 0 : i32
    %c0_i32_0 = arith.constant 0 : i32
    %c0_i32_1 = arith.constant 0 : i32
    return %c0_i32, %c0_i32_0 : i32, i32
  }
  func.func @transform_5(%arg0: i32, %arg1: i32) -> (i32, i32, i32) {
    %c0_i32 = arith.constant 0 : i32
    %c0_i32_0 = arith.constant 0 : i32
    %c0_i32_1 = arith.constant 0 : i32
    return %arg0, %c0_i32, %c0_i32_0 : i32, i32, i32
  }
}

</mosaic_0001>

<bundles_post_ra>
// kernel: tpu_custom_call.1
= control target key start
LH: loop header
LB: loop body
LE: loop exit
PB: predicated region body
PF: predicated region fallthrough
CT: control target
= control target key end

     0   :  { %10 = vsyncpa [#allocation4], 0  ;;  %s2015_s0 = inlined_call_operand.vmem [shape: bf16[2,256,36], index: 0, kind: input, shape index: {}]   ;;  %s2016_s1 = inlined_call_operand.vmem [shape: bf16[36,128], index: 1, kind: input, shape index: {}]   ;;  %s2017_s2 = inlined_call_operand.vmem [shape: f32[1,128], index: 2, kind: input, shape index: {}]   ;;  %s2018_s3 = inlined_call_operand.vmem [shape: f32[128,128], index: 3, kind: input, shape index: {}]   ;;  %s2019_s4 = inlined_call_operand.vmem [shape: f32[1,128], index: 4, kind: input, shape index: {}]   ;;  %s2020_s5 = inlined_call_operand.hbm [shape: f32[2,1,128], index: 5, kind: output, shape index: {}]  }
   0x1   :  { %12 = vsyncpa [#allocation4 + $0x1], 0  ;;  %s1588_s18 = smov 0   ;;  %s1590_s19 = smov 0  }
   0x2   :  { %s1592_s20 = smov 0   ;;  %s1594_s21 = smov 0  }
   0x3   :  { %s1596_s22 = smov 0   ;;  %s1598_s23 = smov 0  }
   0x4 LB: > { %s1049_s24 = sadd.s32 4294967295, %s1552_s23   ;;  %s1050_s25 = sadd.s32 4294967294, %s1552_s23   ;;  %s1552_s23 = sphi %s1598_s23, %s18_s23   ;;  %s1548_s22 = sphi %s1596_s22, %s2027_s22   ;;  %s1544_s21 = sphi %s1594_s21, %s2026_s21   ;;  %s1540_s20 = sphi %s1592_s20, %s2025_s20   ;;  %s1536_s19 = sphi %s1590_s19, %s2024_s19   ;;  %s1532_s18 = sphi %s1588_s18, %s2023_s18  }
   0x5   : > { %s30_s26 = sadd.s32 1, %s1548_s22  ;;  %s149_s27 = sadd.s32 1, %s1540_s20 }
   0x6   : > { %p32_p0 = scmp.ge.s32.totalorder %s30_s26, 2  ;;  %p159_p1 = scmp.ne.s32.totalorder %s1540_s20, %s1536_s19 }
   0x7   : > { %p160_p2 = scmp.eq.s32.totalorder %s1049_s24, 1  ;;  %p165_p3 = scmp.ne.s32.totalorder %s1536_s19, %s1532_s18 }
   0x8   : > { %s2029_s26 = smov (%p32_p0, %s30_s26), 0  ;;  %p166_p5 = scmp.eq.s32.totalorder %s1050_s25, 1 }
   0x9   : > { %p1628_p4 = por %p160_p2, %p159_p1  ;;  %s146_s29 = ssub.s32 %s1548_s22, %s2029_s26 }
   0xa   : > { %p1053_p6 = scmp.ge.s32.totalorder %s1552_s23, 1  ;;  %p147_p7 = scmp.eq.s32.totalorder %s146_s29, 0 }
   0xb   : > { %p1635_p8 = por %p166_p5, %p165_p3  ;;  %p209_p9 = scmp.lt.s32.totalorder %s1552_s23, 3 }
   0xc   : > { %s1641_s6 = scalar_select %p147_p7, %s1540_s20, %s149_s27  }
   0xd   : > { %p210_p10 = pnand %p1053_p6, %p209_p9 }
   0xe   : > { %v1327_v0 = vld [vmem:[%s2016_s1] sm:$0xff] (!%p210_p10)   ;;  %v1328_v1 = vld [vmem:[%s2016_s1 + $0x8] sm:$0xff] (!%p210_p10)   ;;  %p241_p11 = scmp.lt.s32.totalorder (!%p210_p10), %s1544_s21, 1  ;;  %v1329_v2 = vld [vmem:[%s2016_s1 + $0x10] ss:$0 sps:$4 sm:$0x33] (!%p210_p10)  }
   0xf   : > { %213 = sbr.rel (%p210_p10) target bundleno = 608 (0x260), region = 40  ;;  %1164 = vmatprep.subr.bf16.mxu0 (!%p210_p10), %v1327_v0  ;;  %1261 = vmatprep.subr.bf16.mxu1 (!%p210_p10), %v1327_v0  ;;  %vm444_vm0 = vcmask (!%p210_p10), 1041408   ;;  %vm395_vm1 = vcmask (!%p210_p10), 293888   ;;  %v879_v20 = vld [vmem:[%s2018_s3] sm:$0xff] (!%p210_p10)  ;;  %v880_v21 = vld [vmem:[%s2018_s3 + $0x8] sm:$0xff] (!%p210_p10)  ;;  %v1554_v23 = vmov (!%p210_p10), 0.0|0.0  }
  0x10   : > { %1165 = vmatpush3.bf16.msra.mxu0 (!%p210_p10), %v1327_v0  ;;  %1264 = vmatpush3.bf16.msra.mxu1 (!%p210_p10), %v1327_v0  ;;  %v446_v4 = vsel (!%p210_p10), %vm444_vm0, %v1329_v2, 0  ;;  %v1238_v22 = vpack.c.bf16 (!%p210_p10), %v880_v21, %v879_v20  ;;  %v881_v24 = vld [vmem:[%s2018_s3 + $0x10] sm:$0xff] (!%p210_p10)  ;;  %v882_v25 = vld [vmem:[%s2018_s3 + $0x18] sm:$0xff] (!%p210_p10)  ;;  %v883_v27 = vld [vmem:[%s2018_s3 + $0x20] sm:$0xff] (!%p210_p10)  ;;  %v1555_v34 = vmov (!%p210_p10), 0.0   ;;  %vm1556_vm2 = vmmov (!%p210_p10), 0  }
  0x11   : > { %1166 = vmatprep.subr.bf16.mxu0 (!%p210_p10), %v1328_v1  ;;  %1262 = vmatprep.subr.bf16.mxu1 (!%p210_p10), %v1328_v1  ;;  %v1241_v26 = vpack.c.bf16 (!%p210_p10), %v882_v25, %v881_v24  ;;  %v884_v28 = vld [vmem:[%s2018_s3 + $0x28] sm:$0xff] (!%p210_p10)  ;;  %v885_v30 = vld [vmem:[%s2018_s3 + $0x30] sm:$0xff] (!%p210_p10)  ;;  %v886_v31 = vld [vmem:[%s2018_s3 + $0x38] sm:$0xff] (!%p210_p10)  ;;  %255 = vst [vmem:[#allocation2] sm:$0x1] (!%p210_p10), %v1555_v34  ;;  %s238_s7 = sand.u32 (!%p210_p10), 1, %s1536_s19  }
  0x12   : > { %v1244_v29 = vpack.c.bf16 (!%p210_p10), %v884_v28, %v883_v27  ;;  %v1722_v32 = vld [vmem:[%s2017_s2] ss:$0 sm:$0xff] (!%p210_p10)  ;;  %v1247_v33 = vpack.c.bf16 (!%p210_p10), %v886_v31, %v885_v30  ;;  %v888_v38 = vld [vmem:[%s2018_s3 + $0x48] sm:$0xff] (!%p210_p10)  ;;  %v889_v43 = vld [vmem:[%s2018_s3 + $0x50] sm:$0xff] (!%p210_p10)  ;;  %s1124_s10 = sshll.u32 (!%p210_p10), %s1544_s21, 4  ;;  %s968_s16 = scalar_lea.sflag (!%p210_p10), [#allocation4], %s238_s7 }
  0x13   : > { %v887_v37 = vld [vmem:[%s2018_s3 + $0x40] sm:$0xff] (!%p210_p10)  ;;  %v890_v44 = vld [vmem:[%s2018_s3 + $0x58] sm:$0xff] (!%p210_p10)  ;;  %v892_v57 = vld [vmem:[%s2018_s3 + $0x68] sm:$0xff] (!%p210_p10)  ;;  %s1968_s15 = scalar_lea.hbm (!%p210_p10), %s2020_s5, %s1124_s10 }
  0x14   : > { %1167 = vmatpush3.bf16.msra.mxu0 (!%p210_p10), %v1328_v1  ;;  %1265 = vmatpush3.bf16.msra.mxu1 (!%p210_p10), %v1328_v1  ;;  %v1250_v42 = vpack.c.bf16 (!%p210_p10), %v888_v38, %v887_v37  ;;  %v1253_v54 = vpack.c.bf16 (!%p210_p10), %v890_v44, %v889_v43  ;;  %v891_v56 = vld [vmem:[%s2018_s3 + $0x60] sm:$0xff] (!%p210_p10)  ;;  %v893_v1 = vld [vmem:[%s2018_s3 + $0x70] sm:$0xff] (!%p210_p10) }
  0x15   : > { %1267 = vmatprep.subr.msk.bf16.mxu0 (!%p210_p10), %vm444_vm0, %v1329_v2  ;;  %1268 = vmatprep.subr.msk.bf16.mxu1 (!%p210_p10), %vm444_vm0, %v1329_v2  ;;  %v1256_v61 = vpack.c.bf16 (!%p210_p10), %v892_v57, %v891_v56  ;;  %v894_v2 = vld [vmem:[%s2018_s3 + $0x78] sm:$0xff] (!%p210_p10) }
  0x16   : > { %s242_s11 = scalar_select %p241_p11, %s1544_s21, 1 }
  0x17   : > { %s1557_s21 = smov [#allocation3]  }
  0x18   : > { %s1127_s14 = sshll.u32 %s242_s11, 7  ;;  %1169 = vmatpush3.bf16.msra.mxu0 %v446_v4  ;;  %1266 = vmatpush3.bf16.msra.mxu1 %v446_v4  ;;  %s239_s11 = scalar_lea.vmem [#allocation3], %s238_s7 }
  0x19   : > { %s1657_s17 = scalar_lea.vmem %s2015_s0, %s1127_s14  ;;  %1237 = vmatprep.subr.bf16.mxu1 %v1554_v23  ;;  %s980_s12 = sshll.u32 %s239_s11, 4  ;;  %s1970_s12 = int_to_ptr.vmem [resolvable:$true] %s980_s12 }
  0x1a   : > { %v1330_v3 = vld [vmem:[%s1657_s17] sm:$0xff]   ;;  %v1331_v5 = vld [vmem:[%s1657_s17 + $0x8] sm:$0xff]   ;;  %v1334_v8 = vld [vmem:[%s1657_s17 + $0x10] sm:$0xff]   ;;  %s1478_s24 = sshll.u32 %s1557_s21, 4  ;;  %s1479_s24 = int_to_ptr.vmem [resolvable:$false] %s1478_s24 }
  0x1b   : > { %1170 = vmatprep.mubr.msk.bf16.mxu0 %vm395_vm1, %v1330_v3  ;;  %v1332_v6 = vld [vmem:[%s1657_s17 + $0x40] sm:$0xff]   ;;  %v1333_v7 = vld [vmem:[%s1657_s17 + $0x48] sm:$0xff]   ;;  %v1336_v9 = vld [vmem:[%s1657_s17 + $0x50] sm:$0xff]   ;;  %s1480_s25 = scalar_lea.vmem %s1479_s24, 32  ;;  %p1481_p1 = scmp.lt.s32.totalorder %s1970_s12, %s1479_s24 }
  0x1c   : > { %1186 = vmatprep.mubr.msk.bf16.mxu1 %vm395_vm1, %v1332_v6  ;;  %1171 = vmatmul.mubr.msk.bf16.vlgmr.msra.gmra.mrb[0].mxu0 %vm395_vm1, %v1331_v5  ;;  %v1335_v10 = vld [vmem:[%s1657_s17 + $0x18] sm:$0xff]   ;;  %v1338_v12 = vld [vmem:[%s1657_s17 + $0x20] sm:$0xff]   ;;  %v1339_v14 = vld [vmem:[%s1657_s17 + $0x28] sm:$0xff]  }
  0x1d   : > { %1187 = vmatmul.mubr.msk.bf16.vlgmr.msra.gmra.mrb[0].mxu1 %vm395_vm1, %v1333_v7  ;;  %1174 = vmatprep.mubr.msk.bf16.mxu0 %vm395_vm1, %v1334_v8  ;;  %v1337_v11 = vld [vmem:[%s1657_s17 + $0x58] sm:$0xff]   ;;  %v1340_v13 = vld [vmem:[%s1657_s17 + $0x60] sm:$0xff]   ;;  %v1341_v15 = vld [vmem:[%s1657_s17 + $0x68] sm:$0xff]  }
  0x1e   : > { %1190 = vmatprep.mubr.msk.bf16.mxu1 %vm395_vm1, %v1336_v9  ;;  %v1342_v16 = vld [vmem:[%s1657_s17 + $0x30] sm:$0xff]   ;;  %v1343_v18 = vld [vmem:[%s1657_s17 + $0x38] sm:$0xff]   ;;  %1239 = vmatpush3.bf16.msra.mxu1 %v1238_v22 }
  0x1f   : > { %v1344_v17 = vld [vmem:[%s1657_s17 + $0x70] sm:$0xff]   ;;  %v1345_v19 = vld [vmem:[%s1657_s17 + $0x78] sm:$0xff]   ;;  %1240 = vmatprep.subr.bf16.mxu1 %v1554_v23  ;;  %s1474_s17 = scalar_lea.vmem %s1970_s12, 16 }
  0x20   : > { %p1475_p12 = scmp.ne.s32.totalorder %s1970_s12, %s1474_s17  ;;  %p1482_p2 = scmp.lt.s32.totalorder %s1480_s25, %s1474_s17 }
  0x22   : > { %1242 = vmatpush3.bf16.msra.mxu1 %v1241_v26  ;;  %p1476_p13 = pnand %p1475_p12, %p1628_p4  ;;  %p1483_p3 = por %p1482_p2, %p1481_p1 }
  0x23   : > { %1243 = vmatprep.subr.bf16.mxu1 %v1554_v23 }
  0x24   : > { %1175 = vmatmul.mubr.msk.bf16.gmra.mrb[4].mxu0 %vm395_vm1, %v1335_v10  ;;  %p1477_p0 = pneg %p1476_p13 }
  0x25   : > { %1191 = vmatmul.mubr.msk.bf16.gmra.mrb[4].mxu1 %vm395_vm1, %v1337_v11  ;;  %1178 = vmatprep.mubr.msk.bf16.mxu0 %vm395_vm1, %v1338_v12  ;;  %v1259_v12 = vpack.c.bf16 %v894_v2, %v893_v1 }
  0x26   : > { %1194 = vmatprep.mubr.msk.bf16.mxu1 %vm395_vm1, %v1340_v13  ;;  %1245 = vmatpush3.bf16.msra.mxu1 %v1244_v29  ;;  %p1484_p5 = pnand %p1483_p3, %p1477_p0 }
  0x27   : > { %1246 = vmatprep.subr.bf16.mxu1 %v1554_v23 }
  0x2a   : > { %1248 = vmatpush3.bf16.msra.mxu1 %v1247_v33 }
  0x2b   : > { %1249 = vmatprep.subr.bf16.mxu1 %v1554_v23 }
  0x2c   : > { %1179 = vmatmul.mubr.msk.bf16.gmra.mrb[8].mxu0 %vm395_vm1, %v1339_v14 }
  0x2d   : > { %1195 = vmatmul.mubr.msk.bf16.gmra.mrb[8].mxu1 %vm395_vm1, %v1341_v15  ;;  %1182 = vmatprep.mubr.msk.bf16.mxu0 %vm395_vm1, %v1342_v16 }
  0x2e   : > { %1198 = vmatprep.mubr.msk.bf16.mxu1 %vm395_vm1, %v1344_v17  ;;  %1251 = vmatpush3.bf16.msra.mxu1 %v1250_v42 }
  0x2f   : > { %1252 = vmatprep.subr.bf16.mxu1 %v1554_v23 }
  0x32   : > { %1254 = vmatpush3.bf16.msra.mxu1 %v1253_v54 }
  0x33   : > { %1255 = vmatprep.subr.bf16.mxu1 %v1554_v23 }
  0x34   : > { %1183 = vmatmul.mubr.msk.bf16.gmra.mrb[12].mxu0 %vm395_vm1, %v1343_v18 }
  0x35   : > { %1199 = vmatmul.mubr.msk.bf16.gmra.mrb[12].mxu1 %vm395_vm1, %v1345_v19 }
  0x36   : > { %1234 = vmatprep.mubr.msk.f32.mxu1 %vm1556_vm2, %v1555_v34  ;;  %1257 = vmatpush3.bf16.msra.mxu1 %v1256_v61 }
  0x37   : > { %1258 = vmatprep.subr.bf16.mxu1 %v1554_v23 }
  0x3a   : > { %1260 = vmatpush3.bf16.msra.mxu1 %v1259_v12 }
  0xef   : > { %v1172_v35 = vpop.f32.mrb[0].mxu0 }
  0xf0   : > { %v1724_v36 = vpop.f32.mrb[0].mxu1  ;;  %v1733_v39 = vadd.f32 %v1172_v35, %v1722_v32  ;;  %v482_v40 = vpop.f32.mrb[1].mxu0 }
  0xf1   : > { %v1735_v41 = vpop.f32.mrb[1].mxu1  ;;  %v1745_v45 = vadd.f32 %v1722_v32, %v482_v40  ;;  %v1173_v46 = vpop.f32.mrb[2].mxu0 }
  0xf2   : > { %v1747_v47 = vpop.f32.mrb[2].mxu1  ;;  %v1094_v48 = vmul.f32 -1.442695, %v1733_v39  ;;  %v1751_v49 = vadd.f32 %v1173_v46, %v1722_v32  ;;  %v485_v50 = vpop.f32.mrb[3].mxu0 }
  0xf3   : > { %v1753_v51 = vpop.f32.mrb[3].mxu1  ;;  %v1092_v52 = vmul.f32 -1.442695, %v1745_v45  ;;  %v1757_v53 = vadd.f32 %v1722_v32, %v485_v50 }
  0xf4   : > { %1346 = vpow2.f32 %v1094_v48  ;;  %v1095_v55 = vmul.f32 -1.442695, %v1751_v49 }
  0xf5   : > { %1348 = vpow2.f32 %v1092_v52  ;;  %v1093_v58 = vmul.f32 -1.442695, %v1757_v53 }
  0xf6   : > { %1350 = vpow2.f32 %v1095_v55 }
  0xf7   : > { %1352 = vpow2.f32 %v1093_v58  ;;  %v1176_v59 = vpop.f32.mrb[4].mxu0 }
  0xf8   : > { %v1768_v60 = vpop.f32.mrb[4].mxu1  ;;  %v1771_v62 = vadd.f32 %v1176_v59, %v1722_v32  ;;  %v498_v63 = vpop.f32.mrb[5].mxu0 }
  0xf9   : > { %v1773_v0 = vpop.f32.mrb[5].mxu1  ;;  %v1783_v3 = vadd.f32 %v1722_v32, %v498_v63  ;;  %v1177_v4 = vpop.f32.mrb[6].mxu0 }
  0xfa   : > { %v1785_v5 = vpop.f32.mrb[6].mxu1  ;;  %v1098_v6 = vmul.f32 -1.442695, %v1771_v62  ;;  %v1789_v7 = vadd.f32 %v1177_v4, %v1722_v32  ;;  %v501_v8 = vpop.f32.mrb[7].mxu0 }
  0xfb   : > { %v1791_v9 = vpop.f32.mrb[7].mxu1  ;;  %v1096_v10 = vmul.f32 -1.442695, %v1783_v3  ;;  %v1795_v11 = vadd.f32 %v1722_v32, %v501_v8 }
  0xfc   : > { %1354 = vpow2.f32 %v1098_v6  ;;  %v1099_v13 = vmul.f32 -1.442695, %v1789_v7 }
  0xfd   : > { %1356 = vpow2.f32 %v1096_v10  ;;  %v1097_v14 = vmul.f32 -1.442695, %v1795_v11 }
  0xfe   : > { %v1347_v15 = vpop.eup %1346  ;;  %1358 = vpow2.f32 %v1099_v13 }
  0xff   : > { %v1349_v16 = vpop.eup %1348  ;;  %v707_v17 = vadd.f32 1.0, %v1347_v15  ;;  %1360 = vpow2.f32 %v1097_v14  ;;  %v1180_v18 = vpop.f32.mrb[8].mxu0 }
 0x100   : > { %v1800_v19 = vpop.f32.mrb[8].mxu1  ;;  %v1351_v20 = vpop.eup %1350  ;;  %v705_v21 = vadd.f32 1.0, %v1349_v16  ;;  %v1811_v44 = vadd.f32 %v1180_v18, %v1722_v32 }
 0x101   : > { %v514_v22 = vpop.f32.mrb[9].mxu0  ;;  %v1802_v24 = vpop.f32.mrb[9].mxu1  ;;  %v708_v27 = vadd.f32 1.0, %v1351_v20 }
 0x102   : > { %v1353_v25 = vpop.eup %1352  ;;  %v1181_v26 = vpop.f32.mrb[10].mxu0  ;;  %1362 = vrcp.f32 %v705_v21  ;;  %v1816_v54 = vadd.f32 %v1722_v32, %v514_v22  ;;  %v1102_v1 = vmul.f32 -1.442695, %v1811_v44 }
 0x103   : > { %v1804_v23 = vpop.f32.mrb[10].mxu1  ;;  %v706_v28 = vadd.f32 1.0, %v1353_v25  ;;  %v517_v29 = vpop.f32.mrb[11].mxu0  ;;  %1364 = vrcp.f32 %v707_v17  ;;  %v1821_v57 = vadd.f32 %v1181_v26, %v1722_v32 }
 0x104   : > { %v1806_v30 = vpop.f32.mrb[11].mxu1  ;;  %v1826_v61 = vadd.f32 %v1722_v32, %v517_v29  ;;  %v1100_v4 = vmul.f32 -1.442695, %v1816_v54 }
 0x105   : > { %1366 = vrcp.f32 %v706_v28  ;;  %v1103_v10 = vmul.f32 -1.442695, %v1821_v57 }
 0x106   : > { %v1355_v31 = vpop.eup %1354  ;;  %1368 = vrcp.f32 %v708_v27  ;;  %v1101_v13 = vmul.f32 -1.442695, %v1826_v61 }
 0x107   : > { %v1357_v33 = vpop.eup %1356  ;;  %v711_v34 = vadd.f32 1.0, %v1355_v31  ;;  %v1184_v35 = vpop.f32.mrb[12].mxu0 }
 0x108   : > { %v1808_v37 = vpop.f32.mrb[12].mxu1  ;;  %v1359_v38 = vpop.eup %1358  ;;  %v709_v40 = vadd.f32 1.0, %v1357_v33 }
 0x109   : > { %v530_v42 = vpop.f32.mrb[13].mxu0  ;;  %v1361_v43 = vpop.eup %1360  ;;  %v712_v50 = vadd.f32 1.0, %v1359_v38 }
 0x10a   : > { %v1185_v46 = vpop.f32.mrb[14].mxu0  ;;  %v1813_v48 = vpop.f32.mrb[13].mxu1  ;;  %1370 = vrcp.f32 %v709_v40  ;;  %v710_v52 = vadd.f32 1.0, %v1361_v43  ;;  %v1836_v16 = vadd.f32 %v1722_v32, %v530_v42 }
 0x10b   : > { %v533_v55 = vpop.f32.mrb[15].mxu0  ;;  %v1818_v56 = vpop.f32.mrb[14].mxu1  ;;  %1372 = vrcp.f32 %v711_v34 }
 0x10c   : > { %v1823_v58 = vpop.f32.mrb[15].mxu1  ;;  %v1363_v59 = vpop.eup %1362  ;;  %1374 = vrcp.f32 %v710_v52  ;;  %v1104_v25 = vmul.f32 -1.442695, %v1836_v16 }
 0x10d   : > { %v1365_v63 = vpop.eup %1364  ;;  %1376 = vrcp.f32 %v712_v50  ;;  %v801_v6 = vmul.f32 %v1363_v59, %v1745_v45  ;;  %v1853_v59 = vadd.f32 %v1185_v46, %v1722_v32 }
 0x10e   : > { %v803_v14 = vmul.f32 %v1365_v63, %v1733_v39  ;;  %1378 = vpow2.f32 %v1102_v1  ;;  %v1861_v1 = vadd.f32 %v1722_v32, %v1753_v51 }
 0x10f   : > { %v1367_v2 = vpop.eup %1366  ;;  %1380 = vpow2.f32 %v1100_v4  ;;  %v1866_v4 = vadd.f32 %v1724_v36, %v1722_v32 }
 0x110   : > { %v802_v8 = vmul.f32 %v1367_v2, %v1757_v53  ;;  %v1369_v12 = vpop.eup %1368  ;;  %1382 = vpow2.f32 %v1103_v10  ;;  %v1107_v2 = vmul.f32 -1.442695, %v1853_v59  ;;  %v1109_v51 = vmul.f32 -1.442695, %v1861_v1 }
 0x111   : > { %v804_v17 = vmul.f32 %v1369_v12, %v1751_v49  ;;  %1384 = vpow2.f32 %v1101_v13  ;;  %v1110_v10 = vmul.f32 -1.442695, %v1866_v4  ;;  %v1877_v12 = vadd.f32 %v1722_v32, %v1773_v0 }
 0x112   : > { %v833_v15 = vadd.f32 %v802_v8, %v801_v6  ;;  %1386 = vpow2.f32 %v1104_v25 }
 0x114   : > { %v834_v18 = vadd.f32 %v833_v15, %v803_v14  ;;  %v1371_v45 = vpop.eup %1370 }
 0x115   : > { %v1373_v53 = vpop.eup %1372  ;;  %v805_v20 = vmul.f32 %v1371_v45, %v1783_v3  ;;  %v1845_v3 = vadd.f32 %v1184_v35, %v1722_v32  ;;  %v1856_v35 = vadd.f32 %v1722_v32, %v533_v55  ;;  %v1871_v55 = vadd.f32 %v1747_v47, %v1722_v32 }
 0x116   : > { %v835_v21 = vadd.f32 %v834_v18, %v804_v17  ;;  %v1375_v22 = vpop.eup %1374  ;;  %v807_v28 = vmul.f32 %v1373_v53, %v1771_v62  ;;  %v1883_v47 = vadd.f32 %v1722_v32, %v1791_v9  ;;  %v1887_v17 = vadd.f32 %v1768_v60, %v1722_v32 }
 0x117   : > { %v806_v26 = vmul.f32 %v1375_v22, %v1795_v11  ;;  %v1377_v27 = vpop.eup %1376  ;;  %v1849_v11 = vadd.f32 %v1722_v32, %v1735_v41  ;;  %v1105_v6 = vmul.f32 -1.442695, %v1856_v35  ;;  %v1111_v15 = vmul.f32 -1.442695, %v1871_v55 }
 0x118   : > { %v836_v39 = vadd.f32 %v835_v21, %v805_v20  ;;  %v1379_v49 = vpop.eup %1378  ;;  %v808_v31 = vmul.f32 %v1377_v27, %v1789_v7  ;;  %v1106_v7 = vmul.f32 -1.442695, %v1845_v3  ;;  %v1112_v53 = vmul.f32 -1.442695, %v1877_v12 }
 0x119   : > { %v1381_v34 = vpop.eup %1380  ;;  %v715_v38 = vadd.f32 1.0, %v1379_v49  ;;  %v1108_v63 = vmul.f32 -1.442695, %v1849_v11  ;;  %v1894_v9 = vadd.f32 %v1785_v5, %v1722_v32  ;;  %v1113_v22 = vmul.f32 -1.442695, %v1883_v47 }
 0x11a   : > { %v837_v29 = vadd.f32 %v836_v39, %v806_v26  ;;  %v1383_v40 = vpop.eup %1382  ;;  %v713_v42 = vadd.f32 1.0, %v1381_v34  ;;  %v1114_v25 = vmul.f32 -1.442695, %v1887_v17  ;;  %v1901_v27 = vadd.f32 %v1722_v32, %v1802_v24 }
 0x11b   : > { %v1385_v50 = vpop.eup %1384  ;;  %v716_v62 = vadd.f32 1.0, %v1383_v40  ;;  %v1911_v24 = vadd.f32 %v1800_v19, %v1722_v32  ;;  %v1922_v19 = vadd.f32 %v1722_v32, %v1813_v48 }
 0x11c   : > { %v838_v33 = vadd.f32 %v837_v29, %v807_v28  ;;  %1388 = vrcp.f32 %v713_v42  ;;  %v714_v52 = vadd.f32 1.0, %v1385_v50  ;;  %v1387_v41 = vpop.eup %1386 }
 0x11d   : > { %1390 = vrcp.f32 %v715_v38  ;;  %v717_v46 = vadd.f32 1.0, %v1387_v41  ;;  %v1120_v48 = vmul.f32 -1.442695, %v1922_v19 }
 0x11e   : > { %v839_v43 = vadd.f32 %v838_v33, %v808_v31  ;;  %1392 = vrcp.f32 %v714_v52  ;;  %v1115_v31 = vmul.f32 -1.442695, %v1894_v9  ;;  %v1907_v33 = vadd.f32 %v1722_v32, %v1806_v30 }
 0x11f   : > { %1394 = vrcp.f32 %v716_v62  ;;  %v1916_v30 = vadd.f32 %v1804_v23, %v1722_v32  ;;  %v1927_v23 = vadd.f32 %v1722_v32, %v1823_v58 }
 0x120   : > { %1396 = vpow2.f32 %v1106_v7  ;;  %v1117_v50 = vmul.f32 -1.442695, %v1907_v33  ;;  %v1118_v7 = vmul.f32 -1.442695, %v1911_v24 }
 0x121   : > { %1398 = vpow2.f32 %v1108_v63  ;;  %v1121_v58 = vmul.f32 -1.442695, %v1927_v23 }
 0x122   : > { %1400 = vrcp.f32 %v717_v46 }
 0x123   : > { %1402 = vpow2.f32 %v1107_v2  ;;  %v1119_v2 = vmul.f32 -1.442695, %v1916_v30 }
 0x124   : > { %1404 = vpow2.f32 %v1105_v6 }
 0x125   : > { %1406 = vpow2.f32 %v1109_v51  ;;  %v1931_v51 = vadd.f32 %v1808_v37, %v1722_v32 }
 0x126   : > { %v1389_v8 = vpop.eup %1388  ;;  %1408 = vpow2.f32 %v1110_v10 }
 0x127   : > { %v1391_v36 = vpop.eup %1390  ;;  %v809_v13 = vmul.f32 %v1389_v8, %v1816_v54  ;;  %1410 = vpow2.f32 %v1111_v15 }
 0x128   : > { %v1393_v14 = vpop.eup %1392  ;;  %v811_v20 = vmul.f32 %v1391_v36, %v1811_v44  ;;  %1412 = vpow2.f32 %v1112_v53 }
 0x129   : > { %v840_v18 = vadd.f32 %v839_v43, %v809_v13  ;;  %v810_v0 = vmul.f32 %v1393_v14, %v1826_v61  ;;  %v1395_v45 = vpop.eup %1394  ;;  %1414 = vpow2.f32 %v1113_v22  ;;  %v1936_v13 = vadd.f32 %v1818_v56, %v1722_v32 }
 0x12a   : > { %v1397_v54 = vpop.eup %1396  ;;  %v812_v61 = vmul.f32 %v1395_v45, %v1821_v57  ;;  %1416 = vpow2.f32 %v1114_v25 }
 0x12b   : > { %v841_v21 = vadd.f32 %v840_v18, %v810_v0  ;;  %v1399_v60 = vpop.eup %1398  ;;  %v719_v44 = vadd.f32 1.0, %v1397_v54  ;;  %v1122_v0 = vmul.f32 -1.442695, %v1931_v51  ;;  %v1123_v32 = vmul.f32 -1.442695, %v1936_v13 }
 0x12c   : > { %v1401_v26 = vpop.eup %1400  ;;  %v721_v42 = vadd.f32 1.0, %v1399_v60 }
 0x12d   : > { %v842_v39 = vadd.f32 %v841_v21, %v811_v20  ;;  %v1403_v28 = vpop.eup %1402  ;;  %v813_v29 = vmul.f32 %v1401_v26, %v1836_v16  ;;  %v1116_v16 = vmul.f32 -1.442695, %v1901_v27  ;;  %1418 = vrcp.f32 %v719_v44 }
 0x12e   : > { %v1405_v49 = vpop.eup %1404  ;;  %v720_v34 = vadd.f32 1.0, %v1403_v28 }
 0x12f   : > { %v843_v5 = vadd.f32 %v842_v39, %v812_v61  ;;  %v718_v38 = vadd.f32 1.0, %v1405_v49  ;;  %v1407_v40 = vpop.eup %1406 }
 0x130   : > { %v1409_v43 = vpop.eup %1408  ;;  %v722_v62 = vadd.f32 1.0, %v1407_v40 }
 0x131   : > { %v844_v57 = vadd.f32 %v843_v5, %v813_v29  ;;  %1420 = vrcp.f32 %v718_v38  ;;  %v1411_v52 = vpop.eup %1410  ;;  %v723_v63 = vadd.f32 1.0, %v1409_v43 }
 0x132   : > { %1422 = vpow2.f32 %v1115_v31  ;;  %v1413_v41 = vpop.eup %1412  ;;  %v724_v46 = vadd.f32 1.0, %v1411_v52 }
 0x133   : > { %1424 = vrcp.f32 %v720_v34  ;;  %v1415_v6 = vpop.eup %1414  ;;  %v725_v10 = vadd.f32 1.0, %v1413_v41 }
 0x134   : > { %1426 = vpow2.f32 %v1116_v16  ;;  %v1417_v8 = vpop.eup %1416  ;;  %v726_v15 = vadd.f32 1.0, %v1415_v6 }
 0x135   : > { %1428 = vrcp.f32 %v721_v42  ;;  %v727_v53 = vadd.f32 1.0, %v1417_v8 }
 0x136   : > { %1430 = vpow2.f32 %v1117_v50 }
 0x137   : > { %1432 = vrcp.f32 %v722_v62  ;;  %v1419_v36 = vpop.eup %1418 }
 0x138   : > { %1434 = vpow2.f32 %v1118_v7  ;;  %v815_v20 = vmul.f32 %v1419_v36, %v1845_v3 }
 0x139   : > { %1436 = vrcp.f32 %v723_v63 }
 0x13a   : > { %1438 = vpow2.f32 %v1119_v2 }
 0x13b   : > { %v1421_v14 = vpop.eup %1420  ;;  %1440 = vrcp.f32 %v724_v46 }
 0x13c   : > { %v1423_v18 = vpop.eup %1422  ;;  %v814_v37 = vmul.f32 %v1421_v14, %v1856_v35  ;;  %1442 = vpow2.f32 %v1120_v48 }
 0x13d   : > { %v1425_v45 = vpop.eup %1424  ;;  %1444 = vrcp.f32 %v725_v10  ;;  %v728_v22 = vadd.f32 1.0, %v1423_v18 }
 0x13e   : > { %v1427_v54 = vpop.eup %1426  ;;  %v845_v21 = vadd.f32 %v844_v57, %v814_v37  ;;  %1446 = vpow2.f32 %v1121_v58  ;;  %v816_v25 = vmul.f32 %v1425_v45, %v1853_v59 }
 0x13f   : > { %v1429_v56 = vpop.eup %1428  ;;  %1448 = vrcp.f32 %v726_v15  ;;  %v729_v39 = vadd.f32 1.0, %v1427_v54 }
 0x140   : > { %v1431_v60 = vpop.eup %1430  ;;  %v846_v35 = vadd.f32 %v845_v21, %v815_v20  ;;  %1450 = vpow2.f32 %v1122_v0  ;;  %v817_v44 = vmul.f32 %v1429_v56, %v1849_v11 }
 0x141   : > { %v1433_v61 = vpop.eup %1432  ;;  %1452 = vrcp.f32 %v727_v53  ;;  %v730_v29 = vadd.f32 1.0, %v1431_v60 }
 0x142   : > { %v1435_v26 = vpop.eup %1434  ;;  %v847_v28 = vadd.f32 %v846_v35, %v816_v25  ;;  %1454 = vpow2.f32 %v1123_v32  ;;  %v818_v49 = vmul.f32 %v1433_v61, %v1861_v1 }
 0x143   : > { %v1437_v3 = vpop.eup %1436  ;;  %1456 = vrcp.f32 %v728_v22  ;;  %v731_v34 = vadd.f32 1.0, %v1435_v26 }
 0x144   : > { %v1439_v5 = vpop.eup %1438  ;;  %v848_v31 = vadd.f32 %v847_v28, %v817_v44  ;;  %1458 = vrcp.f32 %v729_v39  ;;  %v819_v38 = vmul.f32 %v1437_v3, %v1866_v4 }
 0x145   : > { %v1441_v57 = vpop.eup %1440  ;;  %v732_v42 = vadd.f32 1.0, %v1439_v5  ;;  %1460 = vrcp.f32 %v730_v29  ;;  %v871_v29 = vld [vmem:[#allocation2] sm:$0x1] }
 0x146   : > { %v1443_v59 = vpop.eup %1442  ;;  %v849_v40 = vadd.f32 %v848_v31, %v818_v49  ;;  %v820_v43 = vmul.f32 %v1441_v57, %v1871_v55  ;;  %1462 = vrcp.f32 %v731_v34 }
 0x147   : > { %v1445_v16 = vpop.eup %1444  ;;  %v733_v52 = vadd.f32 1.0, %v1443_v59  ;;  %1464 = vrcp.f32 %v732_v42 }
 0x148   : > { %v1447_v11 = vpop.eup %1446  ;;  %v850_v50 = vadd.f32 %v849_v40, %v819_v38  ;;  %v821_v1 = vmul.f32 %v1445_v16, %v1877_v12 }
 0x149   : > { %v1449_v62 = vpop.eup %1448  ;;  %v734_v2 = vadd.f32 1.0, %v1447_v11  ;;  %1466 = vrcp.f32 %v733_v52 }
 0x14a   : > { %v1451_v7 = vpop.eup %1450  ;;  %v851_v63 = vadd.f32 %v850_v50, %v820_v43  ;;  %v822_v4 = vmul.f32 %v1449_v62, %v1883_v47 }
 0x14b   : > { %v1453_v41 = vpop.eup %1452  ;;  %v735_v8 = vadd.f32 1.0, %v1451_v7  ;;  %1468 = vrcp.f32 %v734_v2 }
 0x14c   : > { %v1455_v46 = vpop.eup %1454  ;;  %v852_v6 = vadd.f32 %v851_v63, %v821_v1  ;;  %v823_v55 = vmul.f32 %v1453_v41, %v1887_v17 }
 0x14d   : > { %v1457_v48 = vpop.eup %1456  ;;  %v736_v58 = vadd.f32 1.0, %v1455_v46  ;;  %1470 = vrcp.f32 %v735_v8 }
 0x14e   : > { %v853_v10 = vadd.f32 %v852_v6, %v822_v4  ;;  %v1459_v36 = vpop.eup %1458  ;;  %v824_v14 = vmul.f32 %v1457_v48, %v1894_v9 }
 0x14f   : > { %v1461_v15 = vpop.eup %1460  ;;  %v825_v18 = vmul.f32 %v1459_v36, %v1901_v27  ;;  %1472 = vrcp.f32 %v736_v58 }
 0x150   : > { %v854_v12 = vadd.f32 %v853_v10, %v823_v55  ;;  %v1463_v0 = vpop.eup %1462  ;;  %v826_v47 = vmul.f32 %v1461_v15, %v1907_v33 }
 0x151   : > { %v1465_v53 = vpop.eup %1464  ;;  %v827_v17 = vmul.f32 %v1463_v0, %v1911_v24 }
 0x152   : > { %v855_v37 = vadd.f32 %v854_v12, %v824_v14  ;;  %v828_v21 = vmul.f32 %v1465_v53, %v1916_v30 }
 0x153   : > { %v1467_v20 = vpop.eup %1466 }
 0x154   : > { %v856_v45 = vadd.f32 %v855_v37, %v825_v18  ;;  %v829_v56 = vmul.f32 %v1467_v20, %v1922_v19 }
 0x155   : > { %v1469_v9 = vpop.eup %1468 }
 0x156   : > { %v857_v54 = vadd.f32 %v856_v45, %v826_v47  ;;  %v830_v25 = vmul.f32 %v1469_v9, %v1927_v23 }
 0x157   : > { %v1471_v60 = vpop.eup %1470 }
 0x158   : > { %v858_v32 = vadd.f32 %v857_v54, %v827_v17  ;;  %v831_v33 = vmul.f32 %v1471_v60, %v1931_v51  ;;  %v895_v51 = vld [vmem:[%s2019_s4] sm:$0x1] }
 0x159   : > { %v1473_v35 = vpop.eup %1472 }
 0x15a   : > { %v859_v22 = vadd.f32 %v858_v32, %v828_v21  ;;  %v832_v24 = vmul.f32 %v1473_v35, %v1936_v13 }
 0x15c   : > { %v860_v27 = vadd.f32 %v859_v22, %v829_v56 }
 0x15e   : > { %v861_v61 = vadd.f32 %v860_v27, %v830_v25 }
 0x160   : > { %v862_v39 = vadd.f32 %v861_v61, %v831_v33 }
 0x162   : > { %v863_v26 = vadd.f32 %v862_v39, %v832_v24 }
 0x164   : > { %v864_v30 = vrot.slane %v863_v26, 4 }
 0x166   : > { %v865_v44 = vadd.f32 %v864_v30, %v863_v26 }
 0x168   : > { %v866_v28 = vrot.slane %v865_v44, 2 }
 0x16a   : > { %v867_v3 = vadd.f32 %v866_v28, %v865_v44 }
 0x16c   : > { %v868_v19 = vrot.slane %v867_v3, 1 }
 0x16e   : > { %v869_v5 = vadd.f32 %v868_v19, %v867_v3 }
 0x170   : > { %v872_v49 = vadd.f32 %v871_v29, %v869_v5 }
 0x172   : > { %873 = vst [vmem:[#allocation2] sm:$0x1] %v872_v49 }
 0x179   : > { %v877_v23 = vld [vmem:[#allocation2] sm:$0x1] }
 0x17a   : > { %v878_v31 = vmul.f32 0.00390625, %v877_v23 }
 0x17c   : > { %1235 = vmatmul.mubr.f32.vlgmr.msra.gmra.mrb[16].mxu1 %v878_v31 }
 0x24f   : > { %v962_v13 = vpop.f32.mrb[16].mxu1 }
 0x250   : > { %v963_v57 = vadd.f32 %v962_v13, %v895_v51  ;;  %v1236_v34 = vpop.f32.mrb[17].mxu1 }
 0x252   : > { %966 = vst [vmem:[%s239_s11] sm:$0x1] %v963_v57 }
 0x253   : > { %1487 = shalt.err (!%p1484_p5)
}
 0x254   : > { %s1488_s27 = scalar_lea.hbm %s1968_s15, 16  ;;  %s1492_s8 = scalar_lea.hbm %s2020_s5, 32 }
 0x255   : > { %p1489_p6 = scmp.ne.s32.totalorder %s1968_s15, %s1488_s27  ;;  %p1493_p10 = scmp.lt.u32.totalorder %s1968_s15, %s2020_s5 }
 0x256   : > { %p1494_p11 = scmp.lt.u32.totalorder %s1492_s8, %s1488_s27  ;;  %p1496_p13 = scmp.lt.u32.totalorder %s1488_s27, %s1968_s15 }
 0x257   : > { %p1490_p7 = pnand %p1489_p6, %p1628_p4 }
 0x258   : > { %p1495_p12 = por %p1494_p11, %p1493_p10 }
 0x259   : > { %p1491_p9 = pneg %p1490_p7 }
 0x25a   : > { %p1497_p0 = por %p1496_p13, %p1495_p12 }
 0x25c   : > { %p1498_p1 = pnand %p1497_p0, %p1491_p9 }
 0x25e   : > { %1501 = shalt.err (!%p1498_p1)
}
 0x25f   : > { %1269 = dma.vmem_to_hbm [thread:$0]  (%p1628_p4), %s1970_s12, 16, %s1968_s15, %s968_s16  }
 0x260 PF: > { %p1275_p2 = scmp.ge.s32.totalorder %s1552_s23, 2  ;;  %s992_s11 = sand.u32 1, %s1532_s18  }
 0x261   : > { %s993_s13 = scalar_lea.sflag [#allocation4], %s992_s11 }
 0x262   : > { %p1272_p3 = pnand %p1275_p2, %p1635_p8 }
 0x264   : > { %1527 = dma.done.wait (!%p1272_p3), %s993_s13, 16  }
 0x265   : > { %1529 = vsyncadd (!%p1272_p3), %s993_s13, 4294967280  ;;  %s18_s23 = sadd.s32 1, %s1552_s23   ;;  %s2023_s18 = smov %s1536_s19 }
 0x266   : > { %p15_p5 = scmp.ge.s32.totalorder %s18_s23, 4   ;;  %s2024_s19 = smov %s1540_s20 }
 0x267   : > { %s2025_s20 = smov %s1641_s6  ;;  %s2026_s21 = smov %s1548_s22 }
 0x268   : > { %s2027_s22 = smov %s2029_s26  ;;  %17 = sbr.rel (!%p15_p5) target bundleno = 4 (0x4), region = 83 }
 0x26f   :  { %997 = vsyncpa [#allocation4], 1 }
 0x270   :  { %999 = vsyncpa [#allocation4 + $0x1], 1 }

</bundles_post_ra>
